<compile_context>
chip_gen: v7x
topology: tpu7x:2x2x1
jax: 0.10.0
libtpu: 0.0.40
codegen_flags: <defaults>
</compile_context>

<pallas_src>
import jax
import jax.numpy as jnp
from jax.experimental import pallas as pl
from jax.experimental.pallas import tpu as pltpu


# ----------------------------------------------------------------------------
# Pallas kernel: fused (3x3 conv as one GEMM) + bias + ELU, transposed layout.
# ----------------------------------------------------------------------------
def _matmul_bias_elu_kernel(x_ref, w_ref, b_ref, o_ref):
    # x_ref : (9*Cin, TR)    bf16  -- im2col patches, pixel-rows on lanes
    # w_ref : (Cout, 9*Cin)  bf16  -- conv weights, HWIO flattened + transposed
    # b_ref : (Cout, 1)      f32
    # o_ref : (Cout, TR)     f32
    acc = jnp.dot(w_ref[...], x_ref[...], preferred_element_type=jnp.float32)
    acc = acc + b_ref[...]
    # ELU (alpha = 1.0); clamp the exp argument so the inactive branch never
    # produces a transient inf for large positive activations.
    o_ref[...] = jnp.where(acc > 0.0, acc,
                           jnp.exp(jnp.minimum(acc, 0.0)) - 1.0)


def _pick_row_tile(n_rows):
    """Lane-dense (multiple of 128) row tile; prefer >= 2 grid steps (v7x)."""
    tile = 512
    while tile > 128 and (n_rows + tile - 1) // tile < 2:
        tile //= 2
    return tile


def _im2col_t(x_nhwc):
    """(N,H,W,Cin) -> transposed patch matrix (9*Cin, N*H*W) for a 3x3/p1 conv."""
    N, H, W, C = x_nhwc.shape
    xp = jnp.pad(x_nhwc, ((0, 0), (1, 1), (1, 1), (0, 0)))
    taps = [xp[:, dy:dy + H, dx:dx + W, :]
            for dy in range(3) for dx in range(3)]
    pat = jnp.concatenate(taps, axis=-1)           # (N, H, W, 9*C)
    pat = pat.reshape(N * H * W, 9 * C)            # row r = (n, h, w)
    return pat.T                                   # (9*C, N*H*W)


def conv3x3_elu(x_nhwc, w_hwio, bias):
    """3x3 / stride 1 / pad 1 conv + ELU via one Pallas GEMM. Returns NHWC."""
    N, H, W, Cin = x_nhwc.shape
    Cout = w_hwio.shape[-1]
    K9 = 9 * Cin
    R = N * H * W
    TR = _pick_row_tile(R)
    R_pad = ((R + TR - 1) // TR) * TR

    # Glue (XLA): im2col + transpose; bf16 matmul operands.
    patches_t = _im2col_t(x_nhwc).astype(jnp.bfloat16)          # (K9, R)
    if R_pad != R:
        patches_t = jnp.pad(patches_t, ((0, 0), (0, R_pad - R)))
    w_t = w_hwio.reshape(K9, Cout).T.astype(jnp.bfloat16)       # (Cout, K9)
    b_c = bias.reshape(Cout, 1).astype(jnp.float32)             # (Cout, 1)

    out_t = pl.pallas_call(
        _matmul_bias_elu_kernel,
        out_shape=jax.ShapeDtypeStruct((Cout, R_pad), jnp.float32),
        grid=(R_pad // TR,),
        in_specs=[
            pl.BlockSpec((K9, TR), lambda r: (0, r)),
            pl.BlockSpec((Cout, K9), lambda r: (0, 0)),
            pl.BlockSpec((Cout, 1), lambda r: (0, 0)),
        ],
        out_specs=pl.BlockSpec((Cout, TR), lambda r: (0, r)),
        compiler_params=pltpu.CompilerParams(
            dimension_semantics=("parallel",)),
    )(patches_t, w_t, b_c)

    out_t = out_t[:, :R]                                        # (Cout, N*H*W)
    # (Cout, N, H, W) -> NHWC for the next layer / wrapper flatten.
    return jnp.transpose(out_t.reshape(Cout, N, H, W), (1, 2, 3, 0))


# ----------------------------------------------------------------------------
# Crop: reproduces Crop.forward == round(F.grid_sample(..., align_corners=True))
# with zero padding.  (Gather-heavy -> plain JAX glue.)
# TODO(synk): gather-based bilinear resample has no clean Pallas equivalent.
# ----------------------------------------------------------------------------
def crop_bilinear_round(x_nhwc, coords, Ht, Wt):
    # x_nhwc: (N, H, W, C) float; coords: (N, 2) float with (x, y) columns.
    N, H, W, C = x_nhwc.shape
    x = coords[:, 0]
    y = coords[:, 1]
    j = jnp.arange(Wt, dtype=jnp.float32)
    i = jnp.arange(Ht, dtype=jnp.float32)
    # normalized grid exactly as in Crop, then map to pixel coords
    # (align_corners=True): pix = (norm + 1) * (size - 1) / 2
    x_norm = (2.0 / (W - 1)) * (j[None, :] - Wt // 2) \
        + (2.0 / (W - 1)) * (x[:, None] - W // 2)          # (N, Wt)
    y_norm = (2.0 / (H - 1)) * (i[None, :] - Ht // 2) \
        + (2.0 / (H - 1)) * (y[:, None] - H // 2)          # (N, Ht)
    px = (x_norm + 1.0) * (W - 1) / 2.0
    py = (y_norm + 1.0) * (H - 1) / 2.0

    x0 = jnp.floor(px)
    x1 = x0 + 1.0
    y0 = jnp.floor(py)
    y1 = y0 + 1.0
    wx1 = px - x0
    wx0 = 1.0 - wx1
    wy1 = py - y0
    wy0 = 1.0 - wy1

    bidx = jnp.arange(N)[:, None, None]

    def gather(yi, xi):
        valid = ((yi >= 0) & (yi < H))[:, :, None] & \
                ((xi >= 0) & (xi < W))[:, None, :]
        yc = jnp.clip(yi, 0, H - 1).astype(jnp.int32)
        xc = jnp.clip(xi, 0, W - 1).astype(jnp.int32)
        vals = x_nhwc[bidx, yc[:, :, None], xc[:, None, :], :]  # (N,Ht,Wt,C)
        return jnp.where(valid[..., None], vals, 0.0)

    out = (gather(y0, x0) * (wy0[:, :, None] * wx0[:, None, :])[..., None]
           + gather(y0, x1) * (wy0[:, :, None] * wx1[:, None, :])[..., None]
           + gather(y1, x0) * (wy1[:, :, None] * wx0[:, None, :])[..., None]
           + gather(y1, x1) * (wy1[:, :, None] * wx1[:, None, :])[..., None])
    return jnp.round(out)


# ----------------------------------------------------------------------------
# Parameters (synthetic, deterministic)
# ----------------------------------------------------------------------------
def init_params(key, K, num_glyphs, num_ids, num_groups, L, M=16,
                output_filters=8):
    unit = K // 8
    keys = jax.random.split(key, 5 + 4 * L)

    def emb(k, n, d):
        return jax.random.normal(k, (n, d), jnp.float32) * 0.1

    params = {
        'chars_emb': emb(keys[0], 256, 2 * unit),
        'colors_emb': emb(keys[1], 16, unit),
        'specials_emb': emb(keys[2], 256, unit),
        'groups_emb': emb(keys[3], num_groups, unit),
        'ids_emb': emb(keys[4], num_ids, 3 * unit),
    }
    # synthetic id_pairs_table: glyph -> (id, group)
    g = jnp.arange(num_glyphs, dtype=jnp.int32)
    params['id_pairs_table'] = jnp.stack([g % num_ids, g % num_groups], axis=1)

    in_ch = [K] + [M] * (L - 1)
    out_ch = [M] * (L - 1) + [output_filters]
    convs_map, convs_crop = [], []
    kidx = 5
    for li in range(L):
        w1 = jax.random.normal(keys[kidx], (3, 3, in_ch[li], out_ch[li]),
                               jnp.float32) * 0.1
        b1 = jax.random.normal(keys[kidx + 1], (out_ch[li],),
                               jnp.float32) * 0.01
        w2 = jax.random.normal(keys[kidx + 2], (3, 3, in_ch[li], out_ch[li]),
                               jnp.float32) * 0.1
        b2 = jax.random.normal(keys[kidx + 3], (out_ch[li],),
                               jnp.float32) * 0.01
        kidx += 4
        convs_map.append((w1, b1))
        convs_crop.append((w2, b2))
    params['convs_map'] = convs_map
    params['convs_crop'] = convs_crop
    return params


# ----------------------------------------------------------------------------
# GlyphEncoder forward
# ----------------------------------------------------------------------------
def glyph_encoder_forward(inputs, params, crop_dim):
    T, B, H, W = inputs['glyphs'].shape

    # glyphs -> (ids, groups) via lookup table (glue: gather)
    table = params['id_pairs_table']
    ids = table[inputs['glyphs'], 0]
    groups = table[inputs['glyphs'], 1]

    # embeddings, concatenated along the feature axis (same order as PyTorch)
    emb = jnp.concatenate([
        params['chars_emb'][inputs['chars']],
        params['colors_emb'][inputs['colors']],
        params['specials_emb'][inputs['specials']],
        params['groups_emb'][groups],
        params['ids_emb'][ids],
    ], axis=-1)  # (T, B, H, W, K)
    K = emb.shape[-1]

    # layout: NHWC for the conv path (PyTorch uses NCHW; values identical)
    x = emb.reshape(T * B, H, W, K)

    coords = inputs['blstats'].reshape(T * B, -1).astype(jnp.float32)[:, :2]
    crop = crop_bilinear_round(x, coords, crop_dim, crop_dim)

    rep = x
    for (w, b) in params['convs_map']:
        rep = conv3x3_elu(rep, w, b)
    crep = crop
    for (w, b) in params['convs_crop']:
        crep = conv3x3_elu(crep, w, b)

    # match PyTorch flatten order 'B C H W -> B (C H W)'
    glyphs_rep = jnp.transpose(rep, (0, 3, 1, 2)).reshape(T * B, -1)
    crop_rep = jnp.transpose(crep, (0, 3, 1, 2)).reshape(T * B, -1)
    return jnp.concatenate([glyphs_rep, crop_rep], axis=1)


# ----------------------------------------------------------------------------
if __name__ == "__main__":
    # small, module-consistent shapes
    T, B = 2, 2
    H, W = 9, 13          # rows, cols (odd, like NetHack's 21 x 79)
    crop_dim = 5
    K = 16                # embedding_dim, multiple of 8
    L = 2                 # conv layers
    NUM_GLYPHS = 64
    NUM_IDS = 40
    NUM_GROUPS = 6

    key = jax.random.PRNGKey(0)
    k_param, k_gly, k_chr, k_col, k_spc, k_bx, k_by = jax.random.split(key, 7)

    params = init_params(k_param, K, NUM_GLYPHS, NUM_IDS, NUM_GROUPS, L)

    inputs = {
        'glyphs': jax.random.randint(k_gly, (T, B, H, W), 0, NUM_GLYPHS,
                                     jnp.int32),
        'chars': jax.random.randint(k_chr, (T, B, H, W), 0, 256, jnp.int32),
        'colors': jax.random.randint(k_col, (T, B, H, W), 0, 16, jnp.int32),
        'specials': jax.random.randint(k_spc, (T, B, H, W), 0, 256, jnp.int32),
        'blstats': jnp.concatenate(
            [jax.random.randint(k_bx, (T, B, 1), 0, W, jnp.int32),   # x
             jax.random.randint(k_by, (T, B, 1), 0, H, jnp.int32),   # y
             jnp.zeros((T, B, 2), jnp.int32)], axis=-1),             # filler
    }

    out = glyph_encoder_forward(inputs, params, crop_dim)
    out = jax.block_until_ready(out)

    expected_dim = (H * W + crop_dim * crop_dim) * 8  # output_filters = 8
    assert out.shape == (T * B, expected_dim), out.shape
    assert out.dtype == jnp.float32
    assert bool(jnp.all(jnp.isfinite(out)))
    print("KERNEL_OK")
</pallas_src>

<mosaic_0001>
module attributes {stable_mosaic.version = 11 : i64} {
  func.func @_matmul_bias_elu_kernel(%arg0: i32, %arg1: memref<144x256xbf16, #tpu.memory_space<vmem>>, %arg2: memref<16x144xbf16, #tpu.memory_space<vmem>>, %arg3: memref<16x1xf32, #tpu.memory_space<vmem>>, %arg4: memref<16x256xf32, #tpu.memory_space<vmem>>) attributes {dimension_semantics = [#tpu.dimension_semantics<parallel>], iteration_bounds = array<i64: 2>, scalar_prefetch = 0 : i64, scratch_operands = 0 : i64, tpu.core_type = #tpu.core_type<tc>, window_params = [{transform_indices = @transform_0, window_bounds = array<i64: 144, 256>}, {pipeline_mode = #tpu.pipeline_mode<synchronous>, transform_indices = @transform_1, window_bounds = array<i64: 16, 144>}, {pipeline_mode = #tpu.pipeline_mode<synchronous>, transform_indices = @transform_2, window_bounds = array<i64: 16, 1>}, {transform_indices = @transform_3, window_bounds = array<i64: 16, 256>}]} {
    %c0 = arith.constant 0 : index
    %c0_0 = arith.constant 0 : index
    %0 = vector.load %arg2[%c0, %c0_0] : memref<16x144xbf16, #tpu.memory_space<vmem>>, vector<16x144xbf16>
    %c0_1 = arith.constant 0 : index
    %c0_2 = arith.constant 0 : index
    %1 = vector.load %arg1[%c0_1, %c0_2] : memref<144x256xbf16, #tpu.memory_space<vmem>>, vector<144x256xbf16>
    %cst = arith.constant dense<0.000000e+00> : vector<16x256xf32>
    %2 = tpu.matmul %0, %1, %cst {dimension_numbers = #tpu.dot_dimension_numbers<[1], [0], [0], [1], [0, 0, 1, 1], [], []>} : vector<16x144xbf16>, vector<144x256xbf16>, vector<16x256xf32> -> vector<16x256xf32>
    %c0_3 = arith.constant 0 : index
    %c0_4 = arith.constant 0 : index
    %3 = vector.load %arg3[%c0_3, %c0_4] : memref<16x1xf32, #tpu.memory_space<vmem>>, vector<16x1xf32>
    %4 = vector.broadcast %3 : vector<16x1xf32> to vector<16x256xf32>
    %5 = arith.addf %2, %4 : vector<16x256xf32>
    %cst_5 = arith.constant 0.000000e+00 : f32
    %6 = vector.broadcast %cst_5 : f32 to vector<16x256xf32>
    %7 = arith.cmpf ogt, %5, %6 : vector<16x256xf32>
    %cst_6 = arith.constant 0.000000e+00 : f32
    %8 = vector.broadcast %cst_6 : f32 to vector<16x256xf32>
    %9 = arith.minimumf %5, %8 : vector<16x256xf32>
    %10 = math.exp %9 : vector<16x256xf32>
    %cst_7 = arith.constant 1.000000e+00 : f32
    %11 = vector.broadcast %cst_7 : f32 to vector<16x256xf32>
    %12 = arith.subf %10, %11 : vector<16x256xf32>
    %13 = arith.select %7, %5, %12 : vector<16x256xi1>, vector<16x256xf32>
    %c0_8 = arith.constant 0 : index
    %c0_9 = arith.constant 0 : index
    %14 = vector.load %arg4[%c0_8, %c0_9] : memref<16x256xf32, #tpu.memory_space<vmem>>, vector<16x256xf32>
    tpu.vector_store %arg4[%c0_8, %c0_9], %13 {strides = array<i32>} : memref<16x256xf32, #tpu.memory_space<vmem>>, vector<16x256xf32>,
    return
  }
  func.func @transform_0(%arg0: i32) -> (i32, i32) {
    %c0_i32 = arith.constant 0 : i32
    %c0_i32_0 = arith.constant 0 : i32
    return %c0_i32, %arg0 : i32, i32
  }
  func.func @transform_1(%arg0: i32) -> (i32, i32) {
    %c0_i32 = arith.constant 0 : i32
    %c0_i32_0 = arith.constant 0 : i32
    %c0_i32_1 = arith.constant 0 : i32
    return %c0_i32, %c0_i32_0 : i32, i32
  }
  func.func @transform_2(%arg0: i32) -> (i32, i32) {
    %c0_i32 = arith.constant 0 : i32
    %c0_i32_0 = arith.constant 0 : i32
    %c0_i32_1 = arith.constant 0 : i32
    return %c0_i32, %c0_i32_0 : i32, i32
  }
  func.func @transform_3(%arg0: i32) -> (i32, i32) {
    %c0_i32 = arith.constant 0 : i32
    %c0_i32_0 = arith.constant 0 : i32
    return %c0_i32, %arg0 : i32, i32
  }
}

</mosaic_0001>

<bundles_post_ra>
// kernel: tpu_custom_call.1
= control target key start
LH: loop header
LB: loop body
LE: loop exit
PB: predicated region body
PF: predicated region fallthrough
CT: control target
= control target key end

     0   :  { %8 = vsyncpa [#allocation3], 0  ;;  %s936_s0 = inlined_call_operand.hbm [shape: bf16[144,512], index: 0, kind: input, shape index: {}]   ;;  %s937_s1 = inlined_call_operand.vmem [shape: bf16[16,144], index: 1, kind: input, shape index: {}]   ;;  %s938_s2 = inlined_call_operand.vmem [shape: f32[16,1], index: 2, kind: input, shape index: {}]   ;;  %s939_s3 = inlined_call_operand.hbm [shape: f32[16,512], index: 3, kind: output, shape index: {}]  }
   0x1   :  { %10 = vsyncpa [#allocation3 + $0x1], 0 }
   0x2   :  { %11 = vsyncpa [#allocation4], 0 }
   0x3   :  { %13 = vsyncpa [#allocation4 + $0x1], 0  ;;  %s745_s12 = smov 0   ;;  %s747_s13 = smov 0  }
   0x4   :  { %s749_s14 = smov 0   ;;  %s751_s15 = smov 0  }
   0x5 LB: > { %s766_s16 = sadd.s32 4294967295, %s714_s15   ;;  %s485_s17 = sadd.s32 4294967294, %s714_s15   ;;  %s714_s15 = sphi %s751_s15, %s952_s15   ;;  %s710_s14 = sphi %s749_s14, %s951_s14   ;;  %s706_s13 = sphi %s747_s13, %s950_s13   ;;  %s702_s12 = sphi %s745_s12, %s949_s12  }
   0x6   : > { %s770_s18 = sadd.s32 1, %s714_s15   ;;  %s26_s19 = sadd.s32 1, %s710_s14 }
   0x7   : > { %s23_s20 = ssub.s32 %s714_s15, %s770_s18  ;;  %p33_p0 = scmp.ne.s32.totalorder %s710_s14, %s706_s13 }
   0x8   : > { %p24_p1 = scmp.eq.s32.totalorder %s23_s20, 0  ;;  %p34_p2 = scmp.eq.s32.totalorder %s714_s15, 0 }
   0x9   : > { %p39_p3 = scmp.ne.s32.totalorder %s706_s13, %s702_s12  ;;  %p40_p4 = scmp.eq.s32.totalorder %s766_s16, 0 }
   0xa   : > { %s782_s21 = scalar_select %p24_p1, %s710_s14, %s26_s19  }
   0xb   : > { %p35_p5 = por %p34_p2, %p33_p0  ;;  %p784_p6 = por %p40_p4, %p39_p3 }
   0xc   : > { %p105_p7 = scmp.eq.s32.totalorder %s766_s16, 1  ;;  %p111_p8 = scmp.eq.s32.totalorder %s485_s17, 1 }
   0xd   : > { %p538_p10 = scmp.lt.s32.totalorder %s714_s15, 2  ;;  %s137_s25 = sand.u32 1, %s710_s14  }
   0xe   : > { %p791_p11 = por %p105_p7, %p33_p0  ;;  %p795_p12 = por %p111_p8, %p39_p3 }
   0xf   : > { %s522_s26 = sshll.u32 %s714_s15, 7  ;;  %s524_s27 = smul.u32 144, %s137_s25 }
  0x10   : > { %s942_s23 = scalar_select %p791_p11, 1, 0 }
  0x11   : > { %s943_s24 = scalar_select %p795_p12, 1, 0 }
  0x12   : > { %s804_s30 = scalar_lea.hbm %s936_s0, %s522_s26  ;;  %p806_p13 = pnand %p538_p10, %p35_p5 }
  0x13   : > { %s141_s5 = scalar_lea.vmem [#allocation2], %s524_s27  ;;  %s813_s7 = scalar_lea.sflag [#allocation3], %s137_s25 }
  0x14   : > { %s148_s6 = sshll.u32 %s141_s5, 4  ;;  %s618_s8 = scalar_lea.hbm %s804_s30, 2304  ;;  %s810_s6 = int_to_ptr.vmem [resolvable:$true] %s148_s6 }
  0x15   : > { %p619_p1 = scmp.ne.s32.totalorder %s804_s30, %s618_s8  ;;  %p620_p2 = pneg %p806_p13 }
  0x16   : > { %s623_s11 = scalar_lea.hbm %s936_s0, 4608  ;;  %p624_p5 = scmp.lt.u32.totalorder %s804_s30, %s936_s0 }
  0x17   : > { %p621_p3 = pnand %p620_p2, %p619_p1  ;;  %p625_p7 = scmp.lt.u32.totalorder %s623_s11, %s618_s8 }
  0x18   : > { %p627_p10 = scmp.lt.u32.totalorder %s618_s8, %s804_s30 }
  0x19   : > { %p622_p4 = pneg %p621_p3  ;;  %p626_p8 = por %p625_p7, %p624_p5 }
  0x1b   : > { %p628_p9 = por %p627_p10, %p626_p8 }
  0x1d   : > { %p629_p0 = pnand %p628_p9, %p622_p4 }
  0x1f   : > { %632 = shalt.err (!%p629_p0)
}
  0x20   : > { %s633_s20 = scalar_lea.vmem %s810_s6, 2304  ;;  %s716_s25 = smov [#allocation2]  }
  0x21   : > { %p634_p1 = scmp.ne.s32.totalorder %s810_s6, %s633_s20  ;;  %s638_s26 = sshll.u32 %s716_s25, 4  ;;  %s639_s26 = int_to_ptr.vmem [resolvable:$false] %s638_s26 }
  0x22   : > { %s640_s27 = scalar_lea.vmem %s639_s26, 4608  ;;  %p641_p11 = scmp.lt.s32.totalorder %s810_s6, %s639_s26 }
  0x23   : > { %p636_p3 = pnand %p634_p1, %p620_p2  ;;  %p642_p5 = scmp.lt.s32.totalorder %s640_s27, %s633_s20 }
  0x25   : > { %p637_p12 = pneg %p636_p3  ;;  %p643_p7 = por %p642_p5, %p641_p11 }
  0x27   : > { %p644_p8 = pnand %p643_p7, %p637_p12 }
  0x29   : > { %647 = shalt.err (!%p644_p8)
}
  0x2a   : > { %s717_s28 = smov 256   ;;  %s718_s29 = smov 128  }
  0x2b   : > { %s719_s5 = smov 8   ;;  %p156_p9 = scmp.lt.s32.totalorder %s714_s15, 3 }
  0x2c   : > { %533 = dma.hbm_to_vmem [thread:$0]  (!%p806_p13), %s804_s30, 2304, %s810_s6, %s813_s7, %s717_s28, %s718_s29, %s719_s5  }
  0x2d   : > { %p945_p0 = scmp.ge.s32.totalorder %s714_s15, 1 }
  0x2f   : > { %p157_p2 = pnand %p945_p0, %p156_p9 }
  0x30   : > { %s845_s8 = sand.u32 (!%p157_p2), 1, %s706_s13  }
  0x31   : > { %160 = sbr.rel (%p157_p2) target bundleno = 345 (0x159), region = 32  ;;  %s163_s10 = scalar_lea.sflag (!%p157_p2), [#allocation3], %s845_s8 }
  0x32   : > { %s525_s9 = smul.u32 (!%p157_p2), 144, %s845_s8 }
  0x34   : > { %s849_s11 = scalar_lea.vmem (!%p157_p2), [#allocation2], %s525_s9 }
  0x38   : > { %693 = dma.done.wait (%p784_p6), %s163_s10, 2304  }
  0x39   : > { %695 = vsyncadd (%p784_p6), %s163_s10, 4294964992  ;;  %v720_v0 = vmov 0   ;;  %v580_v1 = vld [vmem:[%s849_s11 + $0x4] ss:$8 sps:$4 sm:$0xff]   ;;  %v582_v2 = vld [vmem:[%s849_s11] ss:$8 sps:$4 sm:$0xff]  }
  0x3a   : > { %579 = vset.pattern.permute.xlu0 %v720_v0  ;;  %327 = vmatprep.subr.bf16.mxu0 %v580_v1  ;;  %v583_v3 = vld [vmem:[%s849_s11 + $0x14] ss:$8 sps:$4 sm:$0xff]   ;;  %v585_v4 = vld [vmem:[%s849_s11 + $0x10] ss:$8 sps:$4 sm:$0xff]   ;;  %v586_v5 = vld [vmem:[%s849_s11 + $0x24] ss:$8 sps:$4 sm:$0xff]  }
  0x3b   : > { %328 = vmatpush1.bf16.msra.mxu0 %v582_v2  ;;  %v588_v6 = vld [vmem:[%s849_s11 + $0x20] ss:$8 sps:$4 sm:$0xff]   ;;  %v589_v7 = vld [vmem:[%s849_s11 + $0x34] ss:$8 sps:$4 sm:$0xff]   ;;  %v591_v8 = vld [vmem:[%s849_s11 + $0x30] ss:$8 sps:$4 sm:$0xff]  }
  0x3c   : > { %329 = vmatprep.subr.bf16.mxu0 %v583_v3  ;;  %v592_v9 = vld [vmem:[%s849_s11 + $0x44] ss:$8 sps:$4 sm:$0xff]   ;;  %vm323_vm0 = vcmask 130048   ;;  %v594_v12 = vld [vmem:[%s849_s11 + $0x40] ss:$8 sps:$4 sm:$0xff]   ;;  %s491_s25 = sshll.u32 %s845_s8, 5 }
  0x3d   : > { %v609_v10 = vld [vmem:[%s937_s1 + $0x4] ss:$8 sps:$4 sm:$0xff]   ;;  %v597_v15 = vld [vmem:[%s849_s11 + $0x50] ss:$8 sps:$4 sm:$0xff]   ;;  %v600_v17 = vld [vmem:[%s849_s11 + $0x60] ss:$8 sps:$4 sm:$0xff]  }
  0x3e   : > { %v212_v11 = vld [vmem:[%s938_s2] sm:$0xff]  ;;  %512 = vmatprep.mubr.msk.bf16.mxu0 %vm323_vm0, %v609_v10  ;;  %v213_v13 = vld [vmem:[%s938_s2 + $0x8] sm:$0xff]  ;;  %s188_s26 = scalar_lea.vmem [#allocation5], %s491_s25  ;;  %s523_s28 = sshll.u32 %s766_s16, 8 }
  0x3f   : > { %330 = vmatpush1.bf16.msra.mxu0 %v585_v4  ;;  %216 = vperm.xlu0 %579, %v212_v11   ;;  %v595_v14 = vld [vmem:[%s849_s11 + $0x54] ss:$8 sps:$4 sm:$0xff]   ;;  %v598_v16 = vld [vmem:[%s849_s11 + $0x64] ss:$8 sps:$4 sm:$0xff]   ;;  %v603_v19 = vld [vmem:[%s849_s11 + $0x70] ss:$8 sps:$4 sm:$0xff]   ;;  %s892_s16 = scalar_lea.hbm %s939_s3, %s523_s28 }
  0x40   : > { %331 = vmatprep.subr.bf16.mxu0 %v586_v5  ;;  %v601_v18 = vld [vmem:[%s849_s11 + $0x74] ss:$8 sps:$4 sm:$0xff]   ;;  %v604_v20 = vld [vmem:[%s849_s11 + $0x84] ss:$8 sps:$4 sm:$0xff]   ;;  %v606_v21 = vld [vmem:[%s849_s11 + $0x80] ss:$8 sps:$4 sm:$0xff]  }
  0x41   : > { %v607_v22 = vld [vmem:[%s937_s1] ss:$8 sps:$4 sm:$0xff]   ;;  %s412_s27 = sshll.u32 %s188_s26, 4  ;;  %s399_s9 = scalar_lea.sflag [#allocation4], %s845_s8  ;;  %s887_s27 = int_to_ptr.vmem [resolvable:$true] %s412_s27 }
  0x42   : > { %s648_s10 = scalar_lea.vmem %s887_s27, 512  ;;  %p946_p11 = scmp.ne.s32.totalorder %s942_s23, 0 }
  0x43   : > { %332 = vmatpush1.bf16.msra.mxu0 %v588_v6  ;;  %221 = vperm.xlu0 %579, %v213_v13   ;;  %p649_p6 = scmp.ne.s32.totalorder %s887_s27, %s648_s10  ;;  %s721_s11 = smov [#allocation5]  }
  0x44   : > { %333 = vmatprep.subr.bf16.mxu0 %v589_v7  ;;  %s652_s22 = sshll.u32 %s721_s11, 4  ;;  %s653_s22 = int_to_ptr.vmem [resolvable:$false] %s652_s22 }
  0x45   : > { %p650_p12 = pnand %p649_p6, %p946_p11  ;;  %s654_s30 = scalar_lea.vmem %s653_s22, 1024 }
  0x46   : > { %p655_p4 = scmp.lt.s32.totalorder %s887_s27, %s653_s22  ;;  %p656_p10 = scmp.lt.s32.totalorder %s654_s30, %s648_s10 }
  0x47   : > { %334 = vmatpush1.bf16.msra.mxu0 %v591_v8  ;;  %p651_p13 = pneg %p650_p12 }
  0x48   : > { %335 = vmatprep.subr.bf16.mxu0 %v592_v9  ;;  %p657_p1 = por %p656_p10, %p655_p4 }
  0x4a   : > { %p658_p3 = pnand %p657_p1, %p651_p13 }
  0x4b   : > { %336 = vmatpush1.bf16.msra.mxu0 %v594_v12 }
  0x4c   : > { %337 = vmatprep.subr.bf16.mxu0 %v595_v14 }
  0x4f   : > { %338 = vmatpush1.bf16.msra.mxu0 %v597_v15 }
  0x50   : > { %339 = vmatprep.subr.bf16.mxu0 %v598_v16 }
  0x53   : > { %340 = vmatpush1.bf16.msra.mxu0 %v600_v17 }
  0x54   : > { %341 = vmatprep.subr.bf16.mxu0 %v601_v18 }
  0x57   : > { %342 = vmatpush1.bf16.msra.mxu0 %v603_v19 }
  0x58   : > { %343 = vmatprep.subr.bf16.mxu0 %v604_v20 }
  0x5b   : > { %344 = vmatpush1.bf16.msra.mxu0 %v606_v21 }
  0x5e   : > { %360 = vmatmul.mubr.bf16.vlgmr.msra.gmra.mrb[0].mxu0 %v607_v22 }
  0xbe   : > { %v217_v23 = vpop.permute.xlu0 %216 }
  0xc2   : > { %v222_v27 = vpop.permute.xlu0 %221 }
 0x131   : > { %v361_v24 = vpop.f32.mrb[0].mxu0 }
 0x132   : > { %v362_v25 = vadd.f32 %v361_v24, %v217_v23  ;;  %v363_v26 = vpop.f32.mrb[1].mxu0 }
 0x133   : > { %v364_v28 = vadd.f32 %v363_v26, %v217_v23  ;;  %v365_v29 = vpop.f32.mrb[2].mxu0 }
 0x134   : > { %v374_v30 = vmin.f32 %v362_v25, 0.0  ;;  %v366_v31 = vadd.f32 %v365_v29, %v222_v27  ;;  %v367_v32 = vpop.f32.mrb[3].mxu0  ;;  %vm370_vm1 = vcmp.gt.f32.partialorder %v362_v25, 0.0 }
 0x135   : > { %v375_v33 = vmin.f32 %v364_v28, 0.0  ;;  %v368_v34 = vadd.f32 %v367_v32, %v222_v27  ;;  %vm371_vm2 = vcmp.gt.f32.partialorder %v364_v28, 0.0 }
 0x136   : > { %v378_v35 = vmul.f32 1.442695, %v374_v30  ;;  %v376_v36 = vmin.f32 %v366_v31, 0.0  ;;  %vm372_vm3 = vcmp.gt.f32.partialorder %v366_v31, 0.0 }
 0x137   : > { %v380_v37 = vmul.f32 1.442695, %v375_v33  ;;  %v377_v38 = vmin.f32 %v368_v34, 0.0  ;;  %vm373_vm4 = vcmp.gt.f32.partialorder %v368_v34, 0.0 }
 0x138   : > { %610 = vpow2.f32 %v378_v35  ;;  %v382_v39 = vmul.f32 1.442695, %v376_v36 }
 0x139   : > { %612 = vpow2.f32 %v380_v37  ;;  %v384_v40 = vmul.f32 1.442695, %v377_v38 }
 0x13a   : > { %614 = vpow2.f32 %v382_v39 }
 0x13b   : > { %616 = vpow2.f32 %v384_v40 }
 0x142   : > { %v611_v41 = vpop.eup %610 }
 0x143   : > { %v613_v42 = vpop.eup %612  ;;  %v513_v43 = vadd.f32 -1.0, %v611_v41 }
 0x144   : > { %v615_v44 = vpop.eup %614  ;;  %v514_v45 = vadd.f32 -1.0, %v613_v42 }
 0x145   : > { %v617_v46 = vpop.eup %616  ;;  %v390_v47 = vsel %vm370_vm1, %v362_v25, %v513_v43  ;;  %v515_v48 = vadd.f32 -1.0, %v615_v44 }
 0x146   : > { %394 = vst [vmem:[%s188_s26] sm:$0xff] %v390_v47  ;;  %v391_v49 = vsel %vm371_vm2, %v364_v28, %v514_v45  ;;  %v516_v50 = vadd.f32 -1.0, %v617_v46 }
 0x147   : > { %395 = vst [vmem:[%s188_s26 + $0x8] sm:$0xff] %v391_v49  ;;  %v392_v51 = vsel %vm372_vm3, %v366_v31, %v515_v48 }
 0x148   : > { %396 = vst [vmem:[%s188_s26 + $0x10] sm:$0xff] %v392_v51  ;;  %v393_v52 = vsel %vm373_vm4, %v368_v34, %v516_v50 }
 0x149   : > { %397 = vst [vmem:[%s188_s26 + $0x18] sm:$0xff] %v393_v52 }
 0x14a   : > { %661 = shalt.err (!%p658_p3)
}
 0x14b   : > { %s662_s4 = scalar_lea.hbm %s892_s16, 512  ;;  %s666_s17 = scalar_lea.hbm %s939_s3, 1024 }
 0x14c   : > { %p663_p5 = scmp.ne.s32.totalorder %s892_s16, %s662_s4  ;;  %p667_p9 = scmp.lt.u32.totalorder %s892_s16, %s939_s3 }
 0x14d   : > { %p668_p0 = scmp.lt.u32.totalorder %s666_s17, %s662_s4  ;;  %p670_p6 = scmp.lt.u32.totalorder %s662_s4, %s892_s16 }
 0x14e   : > { %p664_p7 = pnand %p663_p5, %p946_p11 }
 0x14f   : > { %p669_p2 = por %p668_p0, %p667_p9 }
 0x150   : > { %p665_p8 = pneg %p664_p7 }
 0x151   : > { %p671_p12 = por %p670_p6, %p669_p2 }
 0x153   : > { %p672_p13 = pnand %p671_p12, %p665_p8 }
 0x155   : > { %675 = shalt.err (!%p672_p13)
}
 0x156   : > { %s722_s25 = smov 256   ;;  %s723_s26 = smov 512  }
 0x157   : > { %s724_s28 = smov 16  }
 0x158   : > { %528 = dma.vmem_to_hbm [thread:$0]  (%p946_p11), %s887_s27, 512, %s892_s16, %s399_s9, %s722_s25, %s723_s26, %s724_s28  }
 0x159 PF: > { %s427_s29 = sand.u32 1, %s702_s12   ;;  %p947_p4 = scmp.ne.s32.totalorder %s943_s24, 0 }
 0x15a   : > { %p948_p10 = scmp.ge.s32.totalorder %s714_s15, 2  ;;  %s428_s5 = scalar_lea.sflag [#allocation4], %s427_s29 }
 0x15c   : > { %p535_p1 = pnand %p948_p10, %p947_p4 }
 0x15e   : > { %697 = dma.done.wait (!%p535_p1), %s428_s5, 512  }
 0x15f   : > { %699 = vsyncadd (!%p535_p1), %s428_s5, 4294966784  ;;  %p16_p3 = scmp.ge.s32.totalorder %s770_s18, 4   ;;  %s949_s12 = smov %s706_s13 }
 0x160   : > { %s950_s13 = smov %s710_s14  ;;  %s951_s14 = smov %s782_s21 }
 0x161   : > { %s952_s15 = smov %s770_s18  ;;  %18 = sbr.rel (!%p16_p3) target bundleno = 5 (0x5), region = 77 }
 0x168   :  { %433 = vsyncpa [#allocation3], 1 }
 0x169   :  { %435 = vsyncpa [#allocation3 + $0x1], 1 }
 0x16a   :  { %436 = vsyncpa [#allocation4], 1 }
 0x16b   :  { %438 = vsyncpa [#allocation4 + $0x1], 1 }

</bundles_post_ra>
